<compile_context>
chip_gen: v7x
topology: tpu7x:2x2x1
jax: 0.10.0
libtpu: 0.0.40
codegen_flags: <defaults>
</compile_context>

<pallas_src>
import functools
import math

import jax
import jax.numpy as jnp
from jax.experimental import pallas as pl
from jax.experimental.pallas import tpu as pltpu


def _round_up(x, m):
    return ((x + m - 1) // m) * m


def _time2vec_cos_kernel(tau_ref, w_ref, b_ref, out_ref, *, k_features):
    # tau_ref: (TB, G*F)  w_ref: (G*F, G*K)  b_ref: (1, G*K)  out_ref: (TB, G*K)
    z = jnp.dot(tau_ref[...], w_ref[...], preferred_element_type=jnp.float32)
    z = z + b_ref[...].astype(jnp.float32)

    gk = out_ref.shape[-1]
    # (1, G*K) mask broadcast over the (TB, G*K) tile; within each K-group the
    # last column is the linear (w0/b0) term, all others get cos().
    col = jax.lax.broadcasted_iota(jnp.int32, (1, gk), 1)
    is_periodic = (col % k_features) != (k_features - 1)
    out = jnp.where(is_periodic, jnp.cos(z), z)
    out_ref[...] = out.astype(out_ref.dtype)


def _choose_fold(f_in, k_out, itemsize, *, max_gf=128, max_wblock_bytes=2 << 20):
    """Batch-fold factor G: G*K multiple of 128 (lane-dense stores), grown until
    the contraction width G*F reaches the MXU width (128), with caps so the
    kron'd resident weight stays small. Returns 1 for the unfolded fallback."""
    g_min = max(1, 128 // math.gcd(k_out, 128))

    def fits(g):
        gf, gk = g * f_in, g * k_out
        return gf <= max_gf and gf * gk * itemsize <= max_wblock_bytes

    if not fits(g_min):
        return 1  # awkward K / large F: fall back to plain (B, K) path
    g = g_min
    while g * 2 * f_in <= max_gf and fits(g * 2):
        g *= 2
    return g


def _choose_tb(rows, tb_max, target_steps=4):
    """Batch tile (in folded rows): multiple of 8, <= tb_max, and >= `target_steps`
    grid steps when rows allow (so v7x megacore has work for both TCs)."""
    if rows <= 8:
        return rows  # single tiny block (full extent is a legal block dim)
    tb = _round_up(pl.cdiv(rows, target_steps), 8)
    return max(8, min(tb, tb_max))


def cosine_activation(tau, w, b, w0, b0, *, tb_max=2048, out_dtype=None):
    """Pallas implementation of CosineActivation.forward.

    tau: (B, in_features)
    w:   (in_features, out_features - 1)
    b:   (out_features - 1,)
    w0:  (in_features, 1)
    b0:  (1,)
    out_dtype: optional narrower output dtype (e.g. jnp.bfloat16) -- opt-in.
    returns: (B, out_features)
    """
    B, F = tau.shape
    K = w.shape[1] + 1  # out_features
    out_dtype = tau.dtype if out_dtype is None else jnp.dtype(out_dtype)
    w_itemsize = jnp.dtype(w.dtype).itemsize

    G = _choose_fold(F, K, w_itemsize)
    GF, GK = G * F, G * K

    # Parameter prep (glue, done once): fuse periodic+linear projections and
    # replicate block-diagonally for the folded layout.
    w_full = jnp.concatenate([w, w0], axis=-1)                     # (F, K)
    b_full = jnp.concatenate([b, b0], axis=-1)                     # (K,)
    w_block = jnp.kron(jnp.eye(G, dtype=w_full.dtype), w_full)     # (G*F, G*K)
    b_block = jnp.tile(b_full, G).reshape(1, GK)                   # (1, G*K)

    rows = pl.cdiv(B, G)
    TB = _choose_tb(rows, tb_max)
    rows_pad = _round_up(rows, TB)          # pad so every grid block is in-bounds
    B_pad = rows_pad * G
    if B_pad != B:
        tau = jnp.pad(tau, ((0, B_pad - B), (0, 0)))
    tau_folded = tau.reshape(rows_pad, GF)  # row-major reshape: free
    grid = (rows_pad // TB,)

    tau_isz = jnp.dtype(tau.dtype).itemsize
    out_isz = jnp.dtype(out_dtype).itemsize
    cost = pl.CostEstimate(
        flops=2 * rows_pad * GF * GK,                  # block-diagonal matmul as executed
        transcendentals=rows_pad * GK,                 # cos runs on every lane pre-where
        bytes_accessed=(rows_pad * GF * tau_isz
                        + (GF * GK + GK) * w_itemsize
                        + rows_pad * GK * out_isz),
    )

    # VMEM budget from the real (double-buffered) tiles + headroom; v5e's
    # default scoped limit is only 16 MiB so always pass it explicitly.
    vmem_need = 2 * (TB * GF * tau_isz
                     + TB * GK * out_isz
                     + (GF * GK + 8 * GK) * w_itemsize)
    vmem_limit = int(min(48 << 20, max(4 << 20, int(vmem_need * 1.5) + (2 << 20))))

    out_folded = pl.pallas_call(
        functools.partial(_time2vec_cos_kernel, k_features=K),
        out_shape=jax.ShapeDtypeStruct((rows_pad, GK), out_dtype),
        grid=grid,
        in_specs=[
            pl.BlockSpec((TB, GF), lambda i: (i, 0)),      # tau tiles (pipelined)
            pl.BlockSpec((GF, GK), lambda i: (0, 0)),      # resident fused weights
            pl.BlockSpec((1, GK), lambda i: (0, 0)),       # resident fused bias
        ],
        out_specs=pl.BlockSpec((TB, GK), lambda i: (i, 0)),
        compiler_params=pltpu.CompilerParams(
            dimension_semantics=("parallel",),             # v7x megacore sharding
            vmem_limit_bytes=vmem_limit,
        ),
        cost_estimate=cost,
    )(tau_folded, w_block, b_block)

    out = out_folded.reshape(B_pad, K)                     # free reshape back
    return out[:B] if B_pad != B else out


def cosine_activation_ref(tau, w, b, w0, b0):
    v1 = jnp.cos(jnp.matmul(tau, w) + b)
    v2 = jnp.matmul(tau, w0) + b0
    return jnp.concatenate([v1, v2], axis=-1)


if __name__ == "__main__":
    key = jax.random.PRNGKey(0)
    k_tau, k_w0, k_b0, k_w, k_b = jax.random.split(key, 5)

    batch = 8
    in_features = 4
    out_features = 16

    tau = jax.random.normal(k_tau, (batch, in_features), dtype=jnp.float32)
    w0 = jax.random.normal(k_w0, (in_features, 1), dtype=jnp.float32)
    b0 = jax.random.normal(k_b0, (1,), dtype=jnp.float32)
    w = jax.random.normal(k_w, (in_features, out_features - 1), dtype=jnp.float32)
    b = jax.random.normal(k_b, (out_features - 1,), dtype=jnp.float32)

    out = jax.block_until_ready(cosine_activation(tau, w, b, w0, b0))
    ref = cosine_activation_ref(tau, w, b, w0, b0)

    assert out.shape == (batch, out_features), out.shape
    assert jnp.allclose(out, ref, atol=1e-5, rtol=1e-5), "mismatch vs reference"

    # Also exercise a larger, multi-grid-step shape to cover tiling paths.
    tau_big = jax.random.normal(k_tau, (1000, in_features), dtype=jnp.float32)
    out_big = jax.block_until_ready(cosine_activation(tau_big, w, b, w0, b0))
    ref_big = cosine_activation_ref(tau_big, w, b, w0, b0)
    assert out_big.shape == (1000, out_features), out_big.shape
    assert jnp.allclose(out_big, ref_big, atol=1e-5, rtol=1e-5), "mismatch (big)"

    print("KERNEL_OK")
</pallas_src>

<mosaic_0001>
module attributes {stable_mosaic.version = 11 : i64} {
  func.func @_time2vec_cos_kernel(%arg0: i32, %arg1: memref<1x128xf32, #tpu.memory_space<vmem>>, %arg2: memref<128x512xf32, #tpu.memory_space<vmem>>, %arg3: memref<1x512xf32, #tpu.memory_space<vmem>>, %arg4: memref<1x512xf32, #tpu.memory_space<vmem>>) attributes {dimension_semantics = [#tpu.dimension_semantics<parallel>], iteration_bounds = array<i64: 1>, scalar_prefetch = 0 : i64, scratch_operands = 0 : i64, tpu.core_type = #tpu.core_type<tc>, window_params = [{transform_indices = @transform_0, window_bounds = array<i64: 1, 128>}, {pipeline_mode = #tpu.pipeline_mode<synchronous>, transform_indices = @transform_1, window_bounds = array<i64: 128, 512>}, {pipeline_mode = #tpu.pipeline_mode<synchronous>, transform_indices = @transform_2, window_bounds = array<i64: 1, 512>}, {transform_indices = @transform_3, window_bounds = array<i64: 1, 512>}]} {
    %c0 = arith.constant 0 : index
    %c0_0 = arith.constant 0 : index
    %0 = vector.load %arg1[%c0, %c0_0] : memref<1x128xf32, #tpu.memory_space<vmem>>, vector<1x128xf32>
    %c0_1 = arith.constant 0 : index
    %c0_2 = arith.constant 0 : index
    %1 = vector.load %arg2[%c0_1, %c0_2] : memref<128x512xf32, #tpu.memory_space<vmem>>, vector<128x512xf32>
    %cst = arith.constant dense<0.000000e+00> : vector<1x512xf32>
    %2 = tpu.matmul %0, %1, %cst {dimension_numbers = #tpu.dot_dimension_numbers<[1], [0], [0], [1], [0, 0, 1, 1], [], []>} : vector<1x128xf32>, vector<128x512xf32>, vector<1x512xf32> -> vector<1x512xf32>
    %c0_3 = arith.constant 0 : index
    %c0_4 = arith.constant 0 : index
    %3 = vector.load %arg3[%c0_3, %c0_4] : memref<1x512xf32, #tpu.memory_space<vmem>>, vector<1x512xf32>
    %4 = arith.addf %2, %3 : vector<1x512xf32>
    %5 = tpu.iota {dimensions = array<i32: 1>} : vector<1x512xi32>
    %c16_i32 = arith.constant 16 : i32
    %c0_i32 = arith.constant 0 : i32
    %6 = arith.cmpi eq, %c16_i32, %c0_i32 : i32
    %c1_i32 = arith.constant 1 : i32
    %7 = arith.select %6, %c1_i32, %c16_i32 : i32
    %8 = vector.broadcast %7 : i32 to vector<1x512xi32>
    %9 = arith.remsi %5, %8 : vector<1x512xi32>
    %c0_i32_5 = arith.constant 0 : i32
    %10 = vector.broadcast %c0_i32_5 : i32 to vector<1x512xi32>
    %11 = arith.cmpi ne, %9, %10 : vector<1x512xi32>
    %c0_i32_6 = arith.constant 0 : i32
    %12 = vector.broadcast %c0_i32_6 : i32 to vector<1x512xi32>
    %13 = arith.cmpi slt, %9, %12 : vector<1x512xi32>
    %c0_i32_7 = arith.constant 0 : i32
    %14 = arith.cmpi slt, %7, %c0_i32_7 : i32
    %15 = vector.broadcast %14 : i1 to vector<1x512xi1>
    %16 = vector.broadcast %15 : vector<1x512xi1> to vector<1x512xi1>
    %17 = arith.xori %13, %16 : vector<1x512xi1>
    %18 = arith.andi %17, %11 : vector<1x512xi1>
    %19 = vector.broadcast %7 : i32 to vector<1x512xi32>
    %20 = arith.addi %9, %19 : vector<1x512xi32>
    %21 = arith.select %18, %20, %9 : vector<1x512xi1>, vector<1x512xi32>
    %c15_i32 = arith.constant 15 : i32
    %22 = vector.broadcast %c15_i32 : i32 to vector<1x512xi32>
    %23 = arith.cmpi ne, %21, %22 : vector<1x512xi32>
    %24 = math.cos %4 : vector<1x512xf32>
    %25 = arith.select %23, %24, %4 : vector<1x512xi1>, vector<1x512xf32>
    %c0_8 = arith.constant 0 : index
    %c0_9 = arith.constant 0 : index
    %26 = vector.load %arg4[%c0_8, %c0_9] : memref<1x512xf32, #tpu.memory_space<vmem>>, vector<1x512xf32>
    tpu.vector_store %arg4[%c0_8, %c0_9], %25 {strides = array<i32>} : memref<1x512xf32, #tpu.memory_space<vmem>>, vector<1x512xf32>,
    return
  }
  func.func @transform_0(%arg0: i32) -> (i32, i32) {
    %c0_i32 = arith.constant 0 : i32
    %c0_i32_0 = arith.constant 0 : i32
    return %arg0, %c0_i32 : i32, i32
  }
  func.func @transform_1(%arg0: i32) -> (i32, i32) {
    %c0_i32 = arith.constant 0 : i32
    %c0_i32_0 = arith.constant 0 : i32
    %c0_i32_1 = arith.constant 0 : i32
    return %c0_i32, %c0_i32_0 : i32, i32
  }
  func.func @transform_2(%arg0: i32) -> (i32, i32) {
    %c0_i32 = arith.constant 0 : i32
    %c0_i32_0 = arith.constant 0 : i32
    %c0_i32_1 = arith.constant 0 : i32
    return %c0_i32, %c0_i32_0 : i32, i32
  }
  func.func @transform_3(%arg0: i32) -> (i32, i32) {
    %c0_i32 = arith.constant 0 : i32
    %c0_i32_0 = arith.constant 0 : i32
    return %arg0, %c0_i32 : i32, i32
  }
}

</mosaic_0001>

<bundles_post_ra>
// kernel: tpu_custom_call.1
= control target key start
LH: loop header
LB: loop body
LE: loop exit
PB: predicated region body
PF: predicated region fallthrough
CT: control target
= control target key end

     0   :  { %8 = vsyncpa [#allocation3], 0  ;;  %s1373_s0 = inlined_call_operand.hbm [shape: f32[1,128], index: 0, kind: input, shape index: {}]   ;;  %s1374_s1 = inlined_call_operand.hbm [shape: f32[128,512], index: 1, kind: input, shape index: {}]   ;;  %s1375_s2 = inlined_call_operand.vmem [shape: f32[1,512], index: 2, kind: input, shape index: {}]   ;;  %s1376_s3 = inlined_call_operand.hbm [shape: f32[1,512], index: 3, kind: output, shape index: {}]  }
   0x1   :  { %9 = vsyncpa [#allocation6], 0 }
   0x2   :  { %10 = vsyncpa [#allocation4], 0  ;;  %s990_s12 = smov [#allocation2]   ;;  %s991_s14 = smov [#allocation5]  }
   0x3   :  { %s17_s13 = sshll.u32 %s990_s12, 4  ;;  %s26_s15 = sshll.u32 %s991_s14, 4  ;;  %s18_s13 = int_to_ptr.vmem [resolvable:$true] %s17_s13  ;;  %s1023_s15 = int_to_ptr.vmem [resolvable:$true] %s26_s15 }
   0x4   :  { %s918_s18 = scalar_lea.hbm %s1373_s0, 16 }
   0x5   :  { %p919_p0 = scmp.ne.s32.totalorder %s1373_s0, %s918_s18  ;;  %p922_p1 = scmp.lt.u32.totalorder %s918_s18, %s1373_s0 }
   0x7   :  { %p924_p2 = pnand %p922_p1, %p919_p0 }
   0x9   :  { %927 = shalt.err (!%p924_p2)
}
   0xa   :  { %s928_s23 = scalar_lea.vmem %s18_s13, 16  ;;  %s932_s24 = scalar_lea.vmem %s18_s13, 32 }
   0xb   :  { %p929_p3 = scmp.ne.s32.totalorder %s18_s13, %s928_s23  ;;  %p933_p4 = scmp.lt.s32.totalorder %s18_s13, %s18_s13 }
   0xc   :  { %p934_p5 = scmp.lt.s32.totalorder %s932_s24, %s928_s23 }
   0xe   :  { %p935_p6 = por %p934_p5, %p933_p4 }
  0x10   :  { %p936_p7 = pnand %p935_p6, %p929_p3 }
  0x12   :  { %939 = shalt.err (!%p936_p7)
}
  0x13   :  { %20 = dma.hbm_to_vmem [thread:$0]  %s1373_s0, 16, %s18_s13, [#allocation3]  }
  0x14   :  { %s940_s29 = scalar_lea.hbm %s1374_s1, 8192 }
  0x15   :  { %p941_p8 = scmp.ne.s32.totalorder %s1374_s1, %s940_s29  ;;  %p944_p9 = scmp.lt.u32.totalorder %s940_s29, %s1374_s1 }
  0x17   :  { %p946_p10 = pnand %p944_p9, %p941_p8 }
  0x19   :  { %949 = shalt.err (!%p946_p10)
}
  0x1a   :  { %s950_s7 = scalar_lea.vmem %s1023_s15, 8192  ;;  %p955_p12 = scmp.lt.s32.totalorder %s1023_s15, %s1023_s15 }
  0x1b   :  { %p951_p11 = scmp.ne.s32.totalorder %s1023_s15, %s950_s7  ;;  %p956_p13 = scmp.lt.s32.totalorder %s950_s7, %s950_s7 }
  0x1d   :  { %p957_p0 = por %p956_p13, %p955_p12 }
  0x1f   :  { %p958_p1 = pnand %p957_p0, %p951_p11 }
  0x21   :  { %961 = shalt.err (!%p958_p1)
}
  0x22   :  { %s992_s0 = smov 512   ;;  %s993_s8 = smov 32  }
  0x23   :  { %32 = dma.hbm_to_vmem [thread:$0]  %s1374_s1, 8192, %s1023_s15, [#allocation6], %s992_s0, %s992_s0, %s993_s8  }
  0x24   :  { %984 = dma.done.wait [#allocation3], 16  }
  0x25   :  { %985 = vsyncadd [#allocation3], 4294967280 }
  0x26   :  { %986 = dma.done.wait [#allocation6], 8192  }
  0x27   :  { %987 = vsyncadd [#allocation6], 4294959104  ;;  %v994_v0 = vmov 0.0   ;;  %v43_v1 = vld [vmem:[#allocation5 + $0x8] sm:$0xff]  ;;  %v45_v3 = vld [vmem:[#allocation5 + $0x18] sm:$0xff] }
  0x28   :  { %192 = vmatprep.mubr.f32.mxu0 %v994_v0  ;;  %263 = vmatprep.mubr.f32.mxu1 %v994_v0  ;;  %v47_v2 = vld [vmem:[#allocation5 + $0x28] sm:$0xff]  ;;  %v49_v5 = vld [vmem:[#allocation5 + $0x38] sm:$0xff]  ;;  %v42_v6 = vld [vmem:[#allocation5] sm:$0xff] }
  0x29   :  { %v809_v4 = vpack.c.bf16 %v47_v2, %v43_v1  ;;  %v46_v7 = vld [vmem:[#allocation5 + $0x20] sm:$0xff]  ;;  %v841_v8 = vpack.c.bf16 %v49_v5, %v45_v3  ;;  %v44_v10 = vld [vmem:[#allocation5 + $0x10] sm:$0xff]  ;;  %v51_v12 = vld [vmem:[#allocation5 + $0x48] sm:$0xff] }
  0x2a   :  { %v811_v9 = vpack.c.bf16 %v46_v7, %v42_v6  ;;  %v48_v11 = vld [vmem:[#allocation5 + $0x30] sm:$0xff]  ;;  %v55_v14 = vld [vmem:[#allocation5 + $0x68] sm:$0xff]  ;;  %v53_v15 = vld [vmem:[#allocation5 + $0x58] sm:$0xff] }
  0x2b   :  { %810 = vmatprep.subr.bf16.mxu0 %v809_v4  ;;  %v843_v13 = vpack.c.bf16 %v48_v11, %v44_v10  ;;  %v57_v16 = vld [vmem:[#allocation5 + $0x78] sm:$0xff]  ;;  %842 = vmatprep.subr.bf16.mxu1 %v841_v8  ;;  %v813_v17 = vpack.c.bf16 %v55_v14, %v51_v12  ;;  %v50_v19 = vld [vmem:[#allocation5 + $0x40] sm:$0xff]  ;;  %v52_v21 = vld [vmem:[#allocation5 + $0x50] sm:$0xff] }
  0x2c   :  { %812 = vmatpush1.bf16.msra.mxu0 %v811_v9  ;;  %v845_v18 = vpack.c.bf16 %v57_v16, %v53_v15  ;;  %v54_v20 = vld [vmem:[#allocation5 + $0x60] sm:$0xff]  ;;  %v56_v23 = vld [vmem:[#allocation5 + $0x70] sm:$0xff]  ;;  %v59_v24 = vld [vmem:[#allocation5 + $0x88] sm:$0xff] }
  0x2d   :  { %844 = vmatpush1.bf16.msra.mxu1 %v843_v13  ;;  %v815_v22 = vpack.c.bf16 %v54_v20, %v50_v19  ;;  %v63_v25 = vld [vmem:[#allocation5 + $0xa8] sm:$0xff]  ;;  %814 = vmatprep.subr.bf16.mxu0 %v813_v17  ;;  %v847_v26 = vpack.c.bf16 %v56_v23, %v52_v21  ;;  %v61_v28 = vld [vmem:[#allocation5 + $0x98] sm:$0xff]  ;;  %v58_v30 = vld [vmem:[#allocation5 + $0x80] sm:$0xff] }
  0x2e   :  { %846 = vmatprep.subr.bf16.mxu1 %v845_v18  ;;  %v817_v27 = vpack.c.bf16 %v63_v25, %v59_v24  ;;  %v65_v29 = vld [vmem:[#allocation5 + $0xb8] sm:$0xff]  ;;  %v62_v32 = vld [vmem:[#allocation5 + $0xa0] sm:$0xff]  ;;  %v60_v33 = vld [vmem:[#allocation5 + $0x90] sm:$0xff] }
  0x2f   :  { %v849_v31 = vpack.c.bf16 %v65_v29, %v61_v28  ;;  %v64_v34 = vld [vmem:[#allocation5 + $0xb0] sm:$0xff]  ;;  %v819_v35 = vpack.c.bf16 %v62_v32, %v58_v30  ;;  %v67_v36 = vld [vmem:[#allocation5 + $0xc8] sm:$0xff]  ;;  %v69_v38 = vld [vmem:[#allocation5 + $0xd8] sm:$0xff] }
  0x30   :  { %816 = vmatpush1.bf16.msra.mxu0 %v815_v22  ;;  %v71_v37 = vld [vmem:[#allocation5 + $0xe8] sm:$0xff]  ;;  %v851_v39 = vpack.c.bf16 %v64_v34, %v60_v33  ;;  %v73_v41 = vld [vmem:[#allocation5 + $0xf8] sm:$0xff]  ;;  %v66_v42 = vld [vmem:[#allocation5 + $0xc0] sm:$0xff]  ;;  %v108_v34 = vlaneseq }
  0x31   :  { %848 = vmatpush1.bf16.msra.mxu1 %v847_v26  ;;  %818 = vmatprep.subr.bf16.mxu0 %v817_v27  ;;  %v821_v40 = vpack.c.bf16 %v71_v37, %v67_v36  ;;  %v70_v43 = vld [vmem:[#allocation5 + $0xe0] sm:$0xff]  ;;  %v853_v44 = vpack.c.bf16 %v73_v41, %v69_v38  ;;  %v68_v45 = vld [vmem:[#allocation5 + $0xd0] sm:$0xff]  ;;  %v75_v47 = vld [vmem:[#allocation5 + $0x108] sm:$0xff] }
  0x32   :  { %850 = vmatprep.subr.bf16.mxu1 %v849_v31  ;;  %v72_v46 = vld [vmem:[#allocation5 + $0xf0] sm:$0xff]  ;;  %v79_v48 = vld [vmem:[#allocation5 + $0x128] sm:$0xff]  ;;  %v77_v49 = vld [vmem:[#allocation5 + $0x118] sm:$0xff]  ;;  %v823_v51 = vpack.c.bf16 %v70_v43, %v66_v42 }
  0x33   :  { %v81_v50 = vld [vmem:[#allocation5 + $0x138] sm:$0xff]  ;;  %v855_v52 = vpack.c.bf16 %v72_v46, %v68_v45  ;;  %v825_v53 = vpack.c.bf16 %v79_v48, %v75_v47  ;;  %v74_v54 = vld [vmem:[#allocation5 + $0x100] sm:$0xff]  ;;  %v76_v56 = vld [vmem:[#allocation5 + $0x110] sm:$0xff] }
  0x34   :  { %820 = vmatpush1.bf16.msra.mxu0 %v819_v35  ;;  %v78_v55 = vld [vmem:[#allocation5 + $0x120] sm:$0xff]  ;;  %v857_v57 = vpack.c.bf16 %v81_v50, %v77_v49  ;;  %v80_v58 = vld [vmem:[#allocation5 + $0x130] sm:$0xff]  ;;  %v83_v59 = vld [vmem:[#allocation5 + $0x148] sm:$0xff]  ;;  %v1055_v35 = vshrl.u32 %v108_v34, 7 }
  0x35   :  { %852 = vmatpush1.bf16.msra.mxu1 %v851_v39  ;;  %822 = vmatprep.subr.bf16.mxu0 %v821_v40  ;;  %v87_v60 = vld [vmem:[#allocation5 + $0x168] sm:$0xff]  ;;  %v85_v61 = vld [vmem:[#allocation5 + $0x158] sm:$0xff]  ;;  %v827_v63 = vpack.c.bf16 %v78_v55, %v74_v54  ;;  %v859_v0 = vpack.c.bf16 %v80_v58, %v76_v56  ;;  %v82_v2 = vld [vmem:[#allocation5 + $0x140] sm:$0xff] }
  0x36   :  { %854 = vmatprep.subr.bf16.mxu1 %v853_v44  ;;  %v89_v62 = vld [vmem:[#allocation5 + $0x178] sm:$0xff]  ;;  %v829_v1 = vpack.c.bf16 %v87_v60, %v83_v59  ;;  %v86_v3 = vld [vmem:[#allocation5 + $0x160] sm:$0xff]  ;;  %v84_v4 = vld [vmem:[#allocation5 + $0x150] sm:$0xff]  ;;  %v110_v36 = vsub.s32 0, %v1055_v35  ;;  %v118_v38 = vsub.s32 2, %v1055_v35  ;;  %v114_v39 = vsub.s32 1, %v1055_v35 }
  0x37   :  { %v861_v5 = vpack.c.bf16 %v89_v62, %v85_v61  ;;  %v88_v6 = vld [vmem:[#allocation5 + $0x170] sm:$0xff]  ;;  %v91_v7 = vld [vmem:[#allocation5 + $0x188] sm:$0xff]  ;;  %v93_v9 = vld [vmem:[#allocation5 + $0x198] sm:$0xff]  ;;  %v831_v11 = vpack.c.bf16 %v86_v3, %v82_v2  ;;  %v122_v55 = vsub.s32 3, %v1055_v35 }
  0x38   :  { %824 = vmatpush1.bf16.msra.mxu0 %v823_v51  ;;  %v95_v8 = vld [vmem:[#allocation5 + $0x1a8] sm:$0xff]  ;;  %v97_v10 = vld [vmem:[#allocation5 + $0x1b8] sm:$0xff]  ;;  %v863_v12 = vpack.c.bf16 %v88_v6, %v84_v4  ;;  %v90_v14 = vld [vmem:[#allocation5 + $0x180] sm:$0xff] }
  0x39   :  { %856 = vmatpush1.bf16.msra.mxu1 %v855_v52  ;;  %826 = vmatprep.subr.bf16.mxu0 %v825_v53  ;;  %v833_v13 = vpack.c.bf16 %v95_v8, %v91_v7  ;;  %v94_v15 = vld [vmem:[#allocation5 + $0x1a0] sm:$0xff]  ;;  %v92_v16 = vld [vmem:[#allocation5 + $0x190] sm:$0xff]  ;;  %v865_v17 = vpack.c.bf16 %v97_v10, %v93_v9  ;;  %v99_v19 = vld [vmem:[#allocation5 + $0x1c8] sm:$0xff] }
  0x3a   :  { %858 = vmatprep.subr.bf16.mxu1 %v857_v57  ;;  %v96_v18 = vld [vmem:[#allocation5 + $0x1b0] sm:$0xff]  ;;  %v103_v20 = vld [vmem:[#allocation5 + $0x1e8] sm:$0xff]  ;;  %v101_v21 = vld [vmem:[#allocation5 + $0x1d8] sm:$0xff]  ;;  %v835_v23 = vpack.c.bf16 %v94_v15, %v90_v14  ;;  %v995_v15 = vmov 683565275  }
  0x3b   :  { %v105_v22 = vld [vmem:[#allocation5 + $0x1f8] sm:$0xff]  ;;  %v867_v24 = vpack.c.bf16 %v96_v18, %v92_v16  ;;  %v837_v25 = vpack.c.bf16 %v103_v20, %v99_v19  ;;  %v98_v26 = vld [vmem:[#allocation5 + $0x1c0] sm:$0xff]  ;;  %v100_v29 = vld [vmem:[#allocation5 + $0x1d0] sm:$0xff]  ;;  %v996_v19 = vmov 2475754826  }
  0x3c   :  { %828 = vmatpush1.bf16.msra.mxu0 %v827_v63  ;;  %v102_v27 = vld [vmem:[#allocation5 + $0x1e0] sm:$0xff]  ;;  %v869_v28 = vpack.c.bf16 %v105_v22, %v101_v21  ;;  %v104_v30 = vld [vmem:[#allocation5 + $0x1f0] sm:$0xff]  ;;  %v41_v33 = vld [vmem:[#allocation2] sm:$0x1]  ;;  %v997_v21 = vmov 2131351028  }
  0x3d   :  { %860 = vmatpush1.bf16.msra.mxu1 %v859_v0  ;;  %830 = vmatprep.subr.bf16.mxu0 %v829_v1  ;;  %v839_v31 = vpack.c.bf16 %v102_v27, %v98_v26  ;;  %v871_v32 = vpack.c.bf16 %v104_v30, %v100_v29  ;;  %v106_v37 = vld [vmem:[%s1375_s2] sm:$0xf]  ;;  %s1002_s2 = smov [#allocation7]  }
  0x3e   :  { %862 = vmatprep.subr.bf16.mxu1 %v861_v5  ;;  %v111_v40 = vrot.slane %v106_v37, %v110_v36  ;;  %v119_v41 = vrot.slane %v106_v37, %v118_v38  ;;  %v115_v42 = vrot.slane %v106_v37, %v114_v39  ;;  %v123_v0 = vrot.slane %v106_v37, %v122_v55  ;;  %s783_s12 = sshll.u32 %s1002_s2, 4  ;;  %s784_s12 = int_to_ptr.vmem [resolvable:$true] %s783_s12 }
  0x3f   :  { %s962_s13 = scalar_lea.vmem %s784_s12, 64  ;;  %p967_p3 = scmp.lt.s32.totalorder %s784_s12, %s784_s12 }
  0x40   :  { %832 = vmatpush1.bf16.msra.mxu0 %v831_v11  ;;  %p963_p2 = scmp.ne.s32.totalorder %s784_s12, %s962_s13  ;;  %p968_p4 = scmp.lt.s32.totalorder %s962_s13, %s962_s13 }
  0x41   :  { %864 = vmatpush1.bf16.msra.mxu1 %v863_v12  ;;  %834 = vmatprep.subr.bf16.mxu0 %v833_v13 }
  0x42   :  { %866 = vmatprep.subr.bf16.mxu1 %v865_v17  ;;  %p969_p5 = por %p968_p4, %p967_p3 }
  0x44   :  { %836 = vmatpush1.bf16.msra.mxu0 %v835_v23  ;;  %v998_v23 = vmov 2102212464   ;;  %p970_p6 = pnand %p969_p5, %p963_p2 }
  0x45   :  { %868 = vmatpush1.bf16.msra.mxu1 %v867_v24  ;;  %838 = vmatprep.subr.bf16.mxu0 %v837_v25  ;;  %v999_v25 = vmov 920167782  }
  0x46   :  { %870 = vmatprep.subr.bf16.mxu1 %v869_v28 }
  0x48   :  { %840 = vmatpush1.bf16.msra.mxu0 %v839_v31 }
  0x49   :  { %872 = vmatpush1.bf16.msra.mxu1 %v871_v32  ;;  %v1000_v32 = vmov 1326507024  }
  0x4b   :  { %193 = vmatmul.mubr.f32.vlgmr.msra.gmra.mrb[0].mxu0 %v41_v33 }
  0x4c   :  { %264 = vmatmul.mubr.f32.vlgmr.msra.gmra.mrb[0].mxu1 %v41_v33 }
 0x11e   :  { %v194_v43 = vpop.f32.mrb[0].mxu0 }
 0x11f   :  { %v1063_v44 = vadd.f32 %v194_v43, %v111_v40  ;;  %v265_v45 = vpop.f32.mrb[0].mxu1  ;;  %v196_v46 = vpop.f32.mrb[1].mxu0 }
 0x120   :  { %v1065_v47 = vadd.f32 %v265_v45, %v119_v41  ;;  %v1067_v48 = vadd.f32 %v196_v46, %v115_v42  ;;  %v267_v49 = vpop.f32.mrb[1].mxu1 }
 0x121   :  { %v327_v50 = vand.u32 2147483647, %v1063_v44  ;;  %v330_v51 = vand.u32 2139095040, %v1063_v44  ;;  %v1079_v9 = vadd.f32 %v267_v49, %v123_v0 }
 0x122   :  { %v533_v52 = vand.u32 2147483647, %v1065_v47  ;;  %v536_v53 = vand.u32 2139095040, %v1065_v47  ;;  %v433_v59 = vand.u32 2139095040, %v1067_v48  ;;  %v430_v12 = vand.u32 2147483647, %v1067_v48 }
 0x123   :  { %v331_v54 = vshrl.u32 %v330_v51, 23  ;;  %v334_v56 = vand.u32 8388607, %v327_v50 }
 0x124   :  { %v537_v57 = vshrl.u32 %v536_v53, 23  ;;  %v540_v58 = vand.u32 8388607, %v533_v52  ;;  %v434_v62 = vshrl.u32 %v433_v59, 23 }
 0x125   :  { %v793_v60 = vadd.s32 4294967169, %v331_v54  ;;  %v335_v1 = vor.u32 8388608, %v334_v56 }
 0x126   :  { %v801_v61 = vadd.s32 4294967169, %v537_v57  ;;  %v541_v2 = vor.u32 8388608, %v540_v58  ;;  %v797_v4 = vadd.s32 4294967169, %v434_v62 }
 0x127   :  { %v337_v63 = vadd.s32 1, %v793_v60  ;;  %v1081_v10 = vshll.u32 %v335_v1, 8 }
 0x128   :  { %v543_v3 = vadd.s32 1, %v801_v61  ;;  %v1083_v11 = vshll.u32 %v541_v2, 8  ;;  %v1086_v13 = vadd.s32 1, %v797_v4 }
 0x129   :  { %vm338_vm0 = vcmp.gt.s32.totalorder %v337_v63, 0 }
 0x12a   :  { %v339_v5 = vsel %vm338_vm0, %v337_v63, 0  ;;  %vm544_vm1 = vcmp.gt.s32.totalorder %v543_v3, 0  ;;  %vm441_vm6 = vcmp.gt.s32.totalorder %v1086_v13, 0 }
 0x12b   :  { %v340_v6 = vshrl.u32 %v339_v5, 5  ;;  %v341_v7 = vand.u32 31, %v339_v5  ;;  %v545_v8 = vsel %vm544_vm1, %v543_v3, 0 }
 0x12c   :  { %v1089_v17 = vshrl.u32 %v545_v8, 5  ;;  %v547_v18 = vand.u32 31, %v545_v8 }
 0x12d   :  { %v342_v14 = vsub.s32 32, %v341_v7  ;;  %v344_v16 = vshll.u32 %v995_v15, %v341_v7  ;;  %v347_v20 = vshll.u32 %v996_v19, %v341_v7  ;;  %v350_v22 = vshll.u32 %v997_v21, %v341_v7 }
 0x12e   :  { %v353_v24 = vshll.u32 %v998_v23, %v341_v7  ;;  %v356_v26 = vshll.u32 %v999_v25, %v341_v7  ;;  %vm359_vm2 = vcmp.lt.s32.totalorder %v340_v6, 1  ;;  %vm360_vm3 = vcmp.lt.s32.totalorder %v340_v6, 2 }
 0x12f   :  { %v345_v27 = vshrl.u32 %v996_v19, %v342_v14  ;;  %v348_v28 = vshrl.u32 %v997_v21, %v342_v14  ;;  %v351_v29 = vshrl.u32 %v998_v23, %v342_v14  ;;  %v343_v30 = vshrl.u32 %v995_v15, %v342_v14 }
 0x130   :  { %v354_v31 = vshrl.u32 %v999_v25, %v342_v14  ;;  %v357_v33 = vshrl.u32 %v1000_v32, %v342_v14  ;;  %v548_v39 = vsub.s32 32, %v547_v18  ;;  %vm361_vm4 = vcmp.lt.s32.totalorder %v340_v6, 3 }
 0x131   :  { %v346_v36 = vor.u32 %v345_v27, %v344_v16  ;;  %v349_v37 = vor.u32 %v348_v28, %v347_v20  ;;  %v352_v38 = vor.u32 %v351_v29, %v350_v22  ;;  %vm362_vm5 = vcmp.lt.s32.totalorder %v340_v6, 4 }
 0x132   :  { %v355_v40 = vor.u32 %v354_v31, %v353_v24  ;;  %v358_v41 = vor.u32 %v357_v33, %v356_v26  ;;  %v550_v54 = vshll.u32 %v995_v15, %v547_v18  ;;  %v551_v57 = vshrl.u32 %v996_v19, %v548_v39 }
 0x133   :  { %v363_v42 = vsel %vm359_vm2, %v343_v30, %v346_v36  ;;  %v364_v43 = vsel %vm362_vm5, %v352_v38, 2102212464  ;;  %v367_v45 = vsel %vm359_vm2, %v346_v36, %v349_v37  ;;  %v371_v46 = vsel %vm359_vm2, %v349_v37, %v352_v38 }
 0x134   :  { %v365_v49 = vsel %vm361_vm4, %v349_v37, %v364_v43  ;;  %v368_v51 = vsel %vm362_vm5, %v355_v40, 920167782  ;;  %v372_v53 = vsel %vm362_vm5, %v358_v41, 1326507024  ;;  %v553_v58 = vshll.u32 %v996_v19, %v547_v18 }
 0x135   :  { %v369_v55 = vsel %vm361_vm4, %v352_v38, %v368_v51  ;;  %v373_v56 = vsel %vm361_vm4, %v355_v40, %v372_v53  ;;  %v366_v59 = vsel %vm360_vm3, %v363_v42, %v365_v49  ;;  %v554_v62 = vshrl.u32 %v997_v21, %v548_v39 }
 0x136   :  { %v370_v60 = vsel %vm360_vm3, %v367_v45, %v369_v55  ;;  %v374_v61 = vsel %vm360_vm3, %v371_v46, %v373_v56  ;;  %v552_v3 = vor.u32 %v551_v57, %v550_v54  ;;  %v556_v5 = vshll.u32 %v997_v21, %v547_v18 }
 0x137   :  { %v1113_v63 = vmul.u32.u64.low %v1081_v10, %v374_v61  ;;  %v1114_v0 = vmul.u32.u64.high %v1081_v10, %v374_v61, %v1113_v63  ;;  %v1117_v1 = vmul.u32.u64.low %v1081_v10, %v370_v60  ;;  %v1118_v2 = vmul.u32.u64.high %v1081_v10, %v370_v60, %v1117_v1 }
 0x138   :  { %v555_v4 = vor.u32 %v554_v62, %v553_v58  ;;  %v557_v7 = vshrl.u32 %v998_v23, %v548_v39  ;;  %v549_v6 = vshrl.u32 %v995_v15, %v548_v39  ;;  %v559_v8 = vshll.u32 %v998_v23, %v547_v18 }
 0x139   :  { %v560_v14 = vshrl.u32 %v999_v25, %v548_v39  ;;  %v563_v16 = vshrl.u32 %v1000_v32, %v548_v39  ;;  %v382_v20 = vmul.u32 %v1081_v10, %v366_v59  ;;  %v562_v24 = vshll.u32 %v999_v25, %v547_v18 }
 0x13a   :  { %v558_v22 = vor.u32 %v557_v7, %v556_v5  ;;  %vm565_vm7 = vcmp.lt.s32.totalorder %v1089_v17, 1  ;;  %vm384_vm8 = vc.u32 %v1114_v0, %v1117_v1  ;;  %v385_v26 = vadd.s32 1, %v1118_v2 }
 0x13b   :  { %v561_v27 = vor.u32 %v560_v14, %v559_v8  ;;  %vm566_vm9 = vcmp.lt.s32.totalorder %v1089_v17, 2  ;;  %v564_v28 = vor.u32 %v563_v16, %v562_v24  ;;  %vm567_vm10 = vcmp.lt.s32.totalorder %v1089_v17, 3 }
 0x13c   :  { %vm568_vm11 = vcmp.lt.s32.totalorder %v1089_v17, 4  ;;  %v573_v29 = vsel %vm565_vm7, %v552_v3, %v555_v4  ;;  %v386_v10 = vsel %vm384_vm8, %v385_v26, %v1118_v2  ;;  %v577_v31 = vsel %vm565_vm7, %v555_v4, %v558_v22 }
 0x13d   :  { %v570_v30 = vsel %vm568_vm11, %v558_v22, 2102212464  ;;  %v574_v18 = vsel %vm568_vm11, %v561_v27, 920167782  ;;  %v387_v33 = vadd.s32 %v386_v10, %v382_v20  ;;  %v569_v36 = vsel %vm565_vm7, %v549_v6, %v552_v3 }
 0x13e   :  { %v575_v37 = vsel %vm567_vm10, %v558_v22, %v574_v18  ;;  %v578_v38 = vsel %vm568_vm11, %v564_v28, 1326507024  ;;  %v571_v39 = vsel %vm567_vm10, %v555_v4, %v570_v30  ;;  %v442_v42 = vsel %vm441_vm6, %v1086_v13, 0 }
 0x13f   :  { %v576_v40 = vsel %vm566_vm9, %v573_v29, %v575_v37  ;;  %v579_v41 = vsel %vm567_vm10, %v561_v27, %v578_v38  ;;  %v388_v43 = vadd.s32 536870912, %v387_v33  ;;  %v437_v54 = vand.u32 8388607, %v430_v12 }
 0x140   :  { %v580_v45 = vsel %vm566_vm9, %v577_v31, %v579_v41  ;;  %v1145_v46 = vmul.u32.u64.low %v1083_v11, %v576_v40  ;;  %v1146_v49 = vmul.u32.u64.high %v1083_v11, %v576_v40, %v1145_v46  ;;  %v572_v13 = vsel %vm566_vm9, %v569_v36, %v571_v39 }
 0x141   :  { %v1150_v51 = vmul.u32.u64.low %v1083_v11, %v580_v45  ;;  %v1151_v53 = vmul.u32.u64.high %v1083_v11, %v580_v45, %v1150_v51  ;;  %v1155_v55 = vshrl.u32 %v388_v43, 30  ;;  %v444_v56 = vand.u32 31, %v442_v42 }
 0x142   :  { %v639_v57 = vand.u32 2139095040, %v1079_v9  ;;  %v591_v59 = vadd.s32 1, %v1146_v49  ;;  %v588_v61 = vmul.u32 %v1083_v11, %v572_v13  ;;  %v438_v2 = vor.u32 8388608, %v437_v54 }
 0x143   :  { %v390_v58 = vshll.u32 %v1155_v55, 30  ;;  %v445_v60 = vsub.s32 32, %v444_v56  ;;  %vm590_vm12 = vc.u32 %v1151_v53, %v1145_v46  ;;  %v447_v4 = vshll.u32 %v995_v15, %v444_v56 }
 0x144   :  { %v592_v63 = vsel %vm590_vm12, %v591_v59, %v1146_v49  ;;  %v640_v17 = vshrl.u32 %v639_v57, 23  ;;  %v443_v6 = vshrl.u32 %v442_v42, 5  ;;  %v450_v8 = vshll.u32 %v996_v19, %v444_v56 }
 0x145   :  { %v1165_v62 = vsub.s32 %v387_v33, %v390_v58  ;;  %v593_v3 = vadd.s32 %v592_v63, %v588_v61  ;;  %v448_v5 = vshrl.u32 %v996_v19, %v445_v60  ;;  %v451_v7 = vshrl.u32 %v997_v21, %v445_v60 }
 0x146   :  { %v453_v11 = vshll.u32 %v997_v21, %v444_v56  ;;  %v454_v14 = vshrl.u32 %v998_v23, %v445_v60  ;;  %v456_v27 = vshll.u32 %v998_v23, %v444_v56  ;;  %v457_v28 = vshrl.u32 %v999_v25, %v445_v60 }
 0x147   :  { %v393_v16 = vsub.s32 0, %v1165_v62  ;;  %v594_v20 = vadd.s32 536870912, %v593_v3  ;;  %v449_v22 = vor.u32 %v448_v5, %v447_v4  ;;  %v452_v24 = vor.u32 %v451_v7, %v450_v8 }
 0x148   :  { %v455_v26 = vor.u32 %v454_v14, %v453_v11  ;;  %v459_v10 = vshll.u32 %v999_v25, %v444_v56  ;;  %v460_v30 = vshrl.u32 %v1000_v32, %v445_v60  ;;  %v805_v18 = vadd.s32 4294967169, %v640_v17 }
 0x149   :  { %v1177_v29 = vshrl.u32 %v594_v20, 30  ;;  %v458_v31 = vor.u32 %v457_v28, %v456_v27  ;;  %vm462_vm13 = vcmp.lt.s32.totalorder %v443_v6, 1  ;;  %v478_v33 = vshll.u32 %v438_v2, 8 }
 0x14a   :  { %v794_v36 = vmin.u32 %v393_v16, %v1165_v62  ;;  %v461_v38 = vor.u32 %v460_v30, %v459_v10  ;;  %vm465_vm14 = vcmp.lt.s32.totalorder %v443_v6, 4  ;;  %vm464_vm15 = vcmp.lt.s32.totalorder %v443_v6, 3 }
 0x14b   :  { %v596_v37 = vshll.u32 %v1177_v29, 30  ;;  %v470_v39 = vsel %vm462_vm13, %v449_v22, %v452_v24  ;;  %v471_v40 = vsel %vm465_vm14, %v458_v31, 920167782  ;;  %v474_v41 = vsel %vm462_vm13, %v452_v24, %v455_v26 }
 0x14c   :  { %v472_v43 = vsel %vm464_vm15, %v455_v26, %v471_v40  ;;  %v475_v45 = vsel %vm465_vm14, %v461_v38, 1326507024  ;;  %v646_v49 = vadd.s32 1, %v805_v18  ;;  %v446_v51 = vshrl.u32 %v995_v15, %v445_v60 }
 0x14d   :  { %v1185_v42 = vsub.s32 %v593_v3, %v596_v37  ;;  %vm463_vm0 = vcmp.lt.s32.totalorder %v443_v6, 2  ;;  %v467_v54 = vsel %vm465_vm14, %v455_v26, 2102212464  ;;  %v476_v13 = vsel %vm464_vm15, %v458_v31, %v475_v45 }
 0x14e   :  { %v395_v56 = vclz %v794_v36  ;;  %v473_v58 = vsel %vm463_vm0, %v470_v39, %v472_v43  ;;  %v477_v59 = vsel %vm463_vm0, %v474_v41, %v476_v13  ;;  %v466_v61 = vsel %vm462_vm13, %v446_v51, %v449_v22 }
 0x14f   :  { %v599_v57 = vsub.s32 0, %v1185_v42  ;;  %v468_v63 = vsel %vm464_vm15, %v452_v24, %v467_v54  ;;  %v1195_v2 = vmul.u32.u64.low %v478_v33, %v477_v59  ;;  %v1196_v17 = vmul.u32.u64.high %v478_v33, %v477_v59, %v1195_v2 }
 0x150   :  { %vm647_vm1 = vcmp.gt.s32.totalorder %v646_v49, 0  ;;  %v1198_v60 = vmul.u32.u64.low %v478_v33, %v473_v58  ;;  %v1199_v3 = vmul.u32.u64.high %v478_v33, %v473_v58, %v1198_v60  ;;  %v795_v4 = vadd.s32 4294967294, %v395_v56 }
 0x151   :  { %v802_v5 = vmin.u32 %v599_v57, %v1185_v42  ;;  %v648_v7 = vsel %vm647_vm1, %v646_v49, 0  ;;  %v469_v8 = vsel %vm463_vm0, %v466_v61, %v468_v63  ;;  %v636_v11 = vand.u32 2147483647, %v1079_v9 }
 0x152   :  { %v650_v14 = vand.u32 31, %v648_v7  ;;  %vm487_vm2 = vc.u32 %v1196_v17, %v1198_v60  ;;  %v488_v16 = vadd.s32 1, %v1199_v3  ;;  %vm796_vm3 = vcmp.lt.s32.totalorder %v795_v4, 0 }
 0x153   :  { %v601_v20 = vclz %v802_v5  ;;  %v485_v22 = vmul.u32 %v478_v33, %v469_v8  ;;  %v643_v26 = vand.u32 8388607, %v636_v11  ;;  %v1211_v6 = vsel %vm796_vm3, 0, %v795_v4 }
 0x154   :  { %v489_v24 = vsel %vm487_vm2, %v488_v16, %v1199_v3  ;;  %v651_v27 = vsub.s32 32, %v650_v14  ;;  %v403_v37 = vsub.s32 4294967266, %v1211_v6  ;;  %v653_v40 = vshll.u32 %v995_v15, %v650_v14 }
 0x155   :  { %v490_v28 = vadd.s32 %v489_v24, %v485_v22  ;;  %v803_v10 = vadd.s32 4294967294, %v601_v20  ;;  %v644_v18 = vor.u32 8388608, %v643_v26  ;;  %v656_v41 = vshll.u32 %v996_v19, %v650_v14 }
 0x156   :  { %v654_v31 = vshrl.u32 %v996_v19, %v651_v27  ;;  %v657_v36 = vshrl.u32 %v997_v21, %v651_v27  ;;  %v660_v33 = vshrl.u32 %v998_v23, %v651_v27  ;;  %v663_v39 = vshrl.u32 %v999_v25, %v651_v27 }
 0x157   :  { %v491_v30 = vadd.s32 536870912, %v490_v28  ;;  %v662_v43 = vshll.u32 %v998_v23, %v650_v14  ;;  %v666_v45 = vshrl.u32 %v1000_v32, %v651_v27  ;;  %vm804_vm4 = vcmp.lt.s32.totalorder %v803_v10, 0 }
 0x158   :  { %v649_v51 = vshrl.u32 %v648_v7, 5  ;;  %v659_v54 = vshll.u32 %v997_v21, %v650_v14  ;;  %v655_v13 = vor.u32 %v654_v31, %v653_v40  ;;  %v658_v56 = vor.u32 %v657_v36, %v656_v41 }
 0x159   :  { %v1216_v38 = vshrl.u32 %v491_v30, 30  ;;  %v664_v57 = vor.u32 %v663_v39, %v662_v43  ;;  %v665_v58 = vshll.u32 %v999_v25, %v650_v14  ;;  %v383_v59 = vadd.s32 %v1117_v1, %v1114_v0 }
 0x15a   :  { %v661_v19 = vor.u32 %v660_v33, %v659_v54  ;;  %v399_v23 = vsub.s32 32, %v1211_v6  ;;  %v404_v63 = vadd.s32 127, %v403_v37  ;;  %v684_v2 = vshll.u32 %v644_v18, 8 }
 0x15b   :  { %v493_v49 = vshll.u32 %v1216_v38, 30  ;;  %v667_v32 = vor.u32 %v666_v45, %v665_v58  ;;  %v604_v3 = vsel %vm804_vm4, 0, %v803_v10  ;;  %vm668_vm5 = vcmp.lt.s32.totalorder %v649_v51, 1 }
 0x15c   :  { %vm671_vm6 = vcmp.lt.s32.totalorder %v649_v51, 4  ;;  %v652_v21 = vshrl.u32 %v995_v15, %v651_v27  ;;  %vm670_vm7 = vcmp.lt.s32.totalorder %v649_v51, 3  ;;  %v676_v5 = vsel %vm668_vm5, %v655_v13, %v658_v56 }
 0x15d   :  { %v494_v61 = vsub.s32 %v490_v28, %v493_v49  ;;  %v677_v25 = vsel %vm671_vm6, %v664_v57, 920167782  ;;  %vm669_vm8 = vcmp.lt.s32.totalorder %v649_v51, 2  ;;  %v673_v0 = vsel %vm671_vm6, %v661_v19, 2102212464 }
 0x15e   :  { %v678_v1 = vsel %vm670_vm7, %v661_v19, %v677_v25  ;;  %v609_v8 = vsub.s32 4294967266, %v604_v3  ;;  %v680_v16 = vsel %vm668_vm5, %v658_v56, %v661_v19  ;;  %v681_v20 = vsel %vm671_vm6, %v667_v32, 1326507024 }
 0x15f   :  { %v496_v4 = vsub.s32 0, %v494_v61  ;;  %v679_v14 = vsel %vm669_vm8, %v676_v5, %v678_v1  ;;  %v405_v22 = vshll.u32 %v404_v63, 23  ;;  %v672_v26 = vsel %vm668_vm5, %v652_v21, %v655_v13 }
 0x160   :  { %v682_v28 = vsel %vm670_vm7, %v664_v57, %v681_v20  ;;  %v674_v15 = vsel %vm670_vm7, %v658_v56, %v673_v0  ;;  %v1236_v10 = vmul.u32.u64.low %v684_v2, %v679_v14  ;;  %v1237_v30 = vmul.u32.u64.high %v684_v2, %v679_v14, %v1236_v10 }
 0x161   :  { %v798_v7 = vmin.u32 %v496_v4, %v494_v61  ;;  %v683_v27 = vsel %vm669_vm8, %v680_v16, %v682_v28  ;;  %v401_v37 = vshrl.u32 %v383_v59, %v399_v23  ;;  %v610_v33 = vadd.s32 127, %v609_v8 }
 0x162   :  { %v1240_v31 = vmul.u32.u64.low %v684_v2, %v683_v27  ;;  %v1241_v36 = vmul.u32.u64.high %v684_v2, %v683_v27, %v1240_v31  ;;  %v400_v39 = vshll.u32 %v1165_v62, %v1211_v6  ;;  %v675_v40 = vsel %vm669_vm8, %v672_v26, %v674_v15 }
 0x163   :  { %v498_v24 = vclz %v798_v7  ;;  %v406_v41 = vor.u32 4788187, %v405_v22  ;;  %v605_v43 = vsub.s32 32, %v604_v3  ;;  %v694_v49 = vadd.s32 1, %v1237_v30 }
 0x164   :  { %v589_v54 = vadd.s32 %v1145_v46, %v1151_v53  ;;  %v486_v13 = vadd.s32 %v1198_v60, %v1196_v17  ;;  %v402_v58 = vor.u32 %v401_v37, %v400_v39  ;;  %v611_v59 = vshll.u32 %v610_v33, 23 }
 0x165   :  { %v799_v18 = vadd.s32 4294967294, %v498_v24  ;;  %v691_v19 = vmul.u32 %v684_v2, %v675_v40  ;;  %vm693_vm10 = vc.u32 %v1241_v36, %v1236_v10  ;;  %v407_v63 = vand.u32 2147483647, %v406_v41 }
 0x166   :  { %v695_v23 = vsel %vm693_vm10, %v694_v49, %v1237_v30  ;;  %v607_v32 = vshrl.u32 %v589_v54, %v605_v43  ;;  %v409_v21 = vcvt.s32.f32 %v402_v58  ;;  %v606_v17 = vshll.u32 %v1185_v42, %v604_v3 }
 0x167   :  { %vm800_vm9 = vcmp.lt.s32.totalorder %v799_v18, 0  ;;  %v696_v4 = vadd.s32 %v695_v23, %v691_v19  ;;  %v612_v60 = vor.u32 4788187, %v611_v59  ;;  %vm329_vm11 = vcmp.lt.s32.totalorder %v1063_v44, 0 }
 0x168   :  { %v501_v45 = vsel %vm800_vm9, 0, %v799_v18  ;;  %v410_v2 = vmul.f32 %v409_v21, %v407_v63  ;;  %v608_v7 = vor.u32 %v607_v32, %v606_v17  ;;  %vm432_vm12 = vcmp.lt.s32.totalorder %v1067_v48, 0 }
 0x169   :  { %v502_v56 = vsub.s32 32, %v501_v45  ;;  %v506_v57 = vsub.s32 4294967266, %v501_v45  ;;  %v503_v62 = vshll.u32 %v494_v61, %v501_v45  ;;  %v697_v5 = vadd.s32 536870912, %v696_v4 }
 0x16a   :  { %v613_v8 = vand.u32 2147483647, %v612_v60  ;;  %v411_v20 = vxor.u32 2147483648, %v410_v2  ;;  %v615_v22 = vcvt.s32.f32 %v608_v7  ;;  %vm1264_vm13 = vcmp.le.f32.partialorder %v327_v50, 0.7853982 }
 0x16b   :  { %v504_v6 = vshrl.u32 %v486_v13, %v502_v56  ;;  %v507_v51 = vadd.s32 127, %v506_v57  ;;  %v1255_v0 = vshrl.u32 %v697_v5, 30  ;;  %vm1275_vm14 = vcmp.le.f32.partialorder %v430_v12, 0.7853982 }
 0x16c   :  { %v616_v26 = vmul.f32 %v615_v22, %v613_v8  ;;  %v412_v42 = vsel %vm329_vm11, %v411_v20, %v410_v2  ;;  %vm535_vm15 = vcmp.lt.s32.totalorder %v1065_v47, 0  ;;  %vm1287_vm1 = vcmp.le.f32.partialorder %v533_v52, 0.7853982 }
 0x16d   :  { %v505_v46 = vor.u32 %v504_v6, %v503_v62  ;;  %v508_v53 = vshll.u32 %v507_v51, 23  ;;  %v699_v14 = vshll.u32 %v1255_v0, 30  ;;  %v415_v37 = vsel %vm1264_vm13, %v1063_v44, %v412_v42 }
 0x16e   :  { %v617_v30 = vxor.u32 2147483648, %v616_v26  ;;  %902 = vcosq.f32 %v415_v37  ;;  %v692_v43 = vadd.s32 %v1236_v10, %v1241_v36  ;;  %v413_v54 = vsub.s32 4, %v1155_v55 }
 0x16f   :  { %v509_v25 = vor.u32 4788187, %v508_v53  ;;  %v512_v1 = vcvt.s32.f32 %v505_v46  ;;  %v700_v24 = vsub.s32 %v696_v4, %v699_v14  ;;  %904 = vsinq.f32 %v415_v37 }
 0x170   :  { %v618_v40 = vsel %vm535_vm15, %v617_v30, %v616_v26  ;;  %v516_v56 = vsub.s32 4, %v1216_v38  ;;  %v414_v10 = vsel %vm329_vm11, %v413_v54, %v1155_v55  ;;  %v619_v36 = vsub.s32 4, %v1177_v29 }
 0x171   :  { %v510_v61 = vand.u32 2147483647, %v509_v25  ;;  %v702_v15 = vsub.s32 0, %v700_v24  ;;  %v621_v13 = vsel %vm1287_vm1, %v1065_v47, %v618_v40  ;;  %v416_v23 = vsel %vm1264_vm13, 0, %v414_v10 }
 0x172   :  { %v517_v62 = vsel %vm432_vm12, %v516_v56, %v1216_v38  ;;  %v271_v4 = vand.u32 127, %v108_v34  ;;  %v620_v55 = vsel %vm535_vm15, %v619_v36, %v1177_v29  ;;  %v420_v60 = vand.u32 3, %v416_v23 }
 0x173   :  { %v513_v16 = vmul.f32 %v512_v1, %v510_v61  ;;  %v806_v3 = vmin.u32 %v702_v15, %v700_v24  ;;  %v519_v53 = vsel %vm1275_vm14, 0, %v517_v62  ;;  %v622_v5 = vsel %vm1287_vm1, 0, %v620_v55 }
 0x174   :  { %v523_v25 = vand.u32 3, %v519_v53  ;;  %v272_v7 = vadd.s32 128, %v271_v4  ;;  %vm1317_vm2 = vcmp.le.f32.partialorder %v636_v11, 0.7853982  ;;  %vm638_vm3 = vcmp.lt.s32.totalorder %v1079_v9, 0 }
 0x175   :  { %v514_v28 = vxor.u32 2147483648, %v513_v16  ;;  %v704_v31 = vclz %v806_v3  ;;  %v626_v26 = vand.u32 3, %v622_v5  ;;  %vm422_vm4 = vcmp.eq.s32.totalorder %v420_v60, 0 }
 0x176   :  { %vm425_vm5 = vcmp.eq.s32.totalorder %v420_v60, 2  ;;  %vm525_vm6 = vcmp.eq.s32.totalorder %v523_v25, 0  ;;  %vm528_vm7 = vcmp.eq.s32.totalorder %v523_v25, 2  ;;  %v279_v37 = vand.u32 15, %v271_v4 }
 0x177   :  { %v515_v18 = vsel %vm432_vm12, %v514_v28, %v513_v16  ;;  %v807_v39 = vadd.s32 4294967294, %v704_v31  ;;  %v722_v16 = vsub.s32 4, %v1255_v0  ;;  %v273_v28 = vadd.s32 256, %v271_v4 }
 0x178   :  { %v518_v50 = vsel %vm1275_vm14, %v1067_v48, %v515_v18  ;;  %v903_v51 = vpop.eup %902  ;;  %v286_v33 = vand.u32 15, %v272_v7  ;;  %vm421_vm8 = vcmp.lt.s32.totalorder %v420_v60, 2  ;;  %vm524_vm9 = vcmp.lt.s32.totalorder %v523_v25, 2 }
 0x179   :  { %vm808_vm0 = vcmp.lt.s32.totalorder %v807_v39, 0  ;;  %906 = vcosq.f32 %v518_v50  ;;  %v905_v46 = vpop.eup %904  ;;  %v426_v1 = vxor.u32 2147483648, %v903_v51  ;;  %v723_v27 = vsel %vm638_vm3, %v722_v16, %v1255_v0 }
 0x17a   :  { %v707_v41 = vsel %vm808_vm0, 0, %v807_v39  ;;  %908 = vsinq.f32 %v518_v50  ;;  %v423_v29 = vxor.u32 2147483648, %v905_v46  ;;  %v274_v39 = vadd.s32 384, %v271_v4 }
 0x17b   :  { %v708_v45 = vsub.s32 32, %v707_v41  ;;  %v712_v49 = vsub.s32 4294967266, %v707_v41  ;;  %v709_v52 = vshll.u32 %v700_v24, %v707_v41  ;;  %910 = vcosq.f32 %v621_v13 }
 0x17c   :  { %912 = vsinq.f32 %v621_v13  ;;  %v424_v15 = vsel %vm422_vm4, %v903_v51, %v423_v29  ;;  %v427_v42 = vsel %vm425_vm5, %v426_v1, %v905_v46  ;;  %vm628_vm10 = vcmp.eq.s32.totalorder %v626_v26, 0 }
 0x17d   :  { %v710_v57 = vshrl.u32 %v692_v43, %v708_v45  ;;  %v713_v58 = vadd.s32 127, %v712_v49  ;;  %v725_v50 = vsel %vm1317_vm2, 0, %v723_v27  ;;  %v428_v40 = vsel %vm421_vm8, %v424_v15, %v427_v42 }
 0x17e   :  { %vm631_vm11 = vcmp.eq.s32.totalorder %v626_v26, 2  ;;  %v293_v41 = vand.u32 15, %v273_v28  ;;  %v1001_v49 = vmov 1966171168   ;;  %vm1333_vm12 = vcmp.ne.s32.totalorder %v279_v37, 15 }
 0x17f   :  { %v711_v59 = vor.u32 %v710_v57, %v709_v52  ;;  %v714_v19 = vshll.u32 %v713_v58, 23  ;;  %v750_v0 = vunpack.c.l.s4 %v1001_v49  ;;  %vm1337_vm13 = vcmp.ne.s32.totalorder %v286_v33, 15 }
 0x180   :  { %vm419_vm14 = vweird.f32 %v1063_v44  ;;  %vm522_vm15 = vweird.f32 %v1067_v48  ;;  %v729_v56 = vand.u32 3, %v725_v50  ;;  %vm627_vm0 = vcmp.lt.s32.totalorder %v626_v26, 2 }
 0x181   :  { %v715_v6 = vor.u32 4788187, %v714_v19  ;;  %v718_v32 = vcvt.s32.f32 %v711_v59  ;;  %v429_v52 = vsel %vm419_vm14, nan, %v428_v40  ;;  %v300_v58 = vand.u32 15, %v274_v39 }
 0x182   :  { %v751_v10 = vunpack.c.0.s8 %v750_v0  ;;  %vm625_vm1 = vweird.f32 %v1065_v47  ;;  %vm731_vm5 = vcmp.eq.s32.totalorder %v729_v56, 0  ;;  %vm774_vm8 = vcmp.lt.s32.totalorder %v108_v34, 512 }
 0x183   :  { %v716_v63 = vand.u32 2147483647, %v715_v6  ;;  %v907_v21 = vpop.eup %906  ;;  %v739_v6 = vsel %vm1333_vm12, %v429_v52, %v1063_v44  ;;  %vm326_vm4 = vcmp.ne.s32.totalorder %v300_v58, 15 }
 0x184   :  { %v909_v38 = vpop.eup %908  ;;  %v529_v22 = vxor.u32 2147483648, %v907_v21  ;;  %v754_v53 = vsub.s32 %v751_v10, %v1055_v35 }
 0x185   :  { %v719_v17 = vmul.f32 %v718_v32, %v716_v63  ;;  %v911_v8 = vpop.eup %910  ;;  %v526_v20 = vxor.u32 2147483648, %v909_v38 }
 0x186   :  { %v913_v24 = vpop.eup %912  ;;  %v632_v3 = vxor.u32 2147483648, %v911_v8  ;;  %v530_v18 = vsel %vm528_vm7, %v529_v22, %v909_v38  ;;  %vm728_vm7 = vweird.f32 %v1079_v9 }
 0x187   :  { %v720_v2 = vxor.u32 2147483648, %v719_v17  ;;  %v527_v30 = vsel %vm525_vm6, %v907_v21, %v526_v20  ;;  %v629_v31 = vxor.u32 2147483648, %v913_v24  ;;  %vm730_vm6 = vcmp.lt.s32.totalorder %v729_v56, 2 }
 0x188   :  { %v531_v12 = vsel %vm524_vm9, %v527_v30, %v530_v18  ;;  %v633_v45 = vsel %vm631_vm11, %v632_v3, %v913_v24 }
 0x189   :  { %v721_v14 = vsel %vm638_vm3, %v720_v2, %v719_v17  ;;  %v630_v43 = vsel %vm628_vm10, %v911_v8, %v629_v31  ;;  %v532_v57 = vsel %vm522_vm15, nan, %v531_v12  ;;  %vm734_vm3 = vcmp.eq.s32.totalorder %v729_v56, 2 }
 0x18a   :  { %v724_v11 = vsel %vm1317_vm2, %v1079_v9, %v721_v14  ;;  %v634_v59 = vsel %vm627_vm0, %v630_v43, %v633_v45  ;;  %v740_v51 = vsel %vm1337_vm13, %v532_v57, %v1067_v48  ;;  %vm1350_vm2 = vcmp.ne.s32.totalorder %v293_v41, 15 }
 0x18b   :  { %914 = vcosq.f32 %v724_v11  ;;  %v635_v63 = vsel %vm625_vm1, nan, %v634_v59  ;;  %v747_v55 = vcombine.low %v739_v6, %v740_v51 }
 0x18c   :  { %916 = vsinq.f32 %v724_v11  ;;  %v741_v48 = vsel %vm1350_vm2, %v635_v63, %v1065_v47 }
 0x18d   :  { %v755_v60 = vrot.slane %v747_v55, %v754_v53 }
 0x195   :  { %v915_v19 = vpop.eup %914 }
 0x196   :  { %v917_v36 = vpop.eup %916  ;;  %v735_v62 = vxor.u32 2147483648, %v915_v19 }
 0x197   :  { %v732_v32 = vxor.u32 2147483648, %v917_v36 }
 0x198   :  { %v736_v4 = vsel %vm734_vm3, %v735_v62, %v917_v36 }
 0x199   :  { %v733_v46 = vsel %vm731_vm5, %v915_v19, %v732_v32 }
 0x19a   :  { %v737_v44 = vsel %vm730_vm6, %v733_v46, %v736_v4 }
 0x19b   :  { %v738_v21 = vsel %vm728_vm7, nan, %v737_v44 }
 0x19c   :  { %v742_v17 = vsel %vm326_vm4, %v738_v21, %v1079_v9 }
 0x19d   :  { %v748_v38 = vcombine.low %v741_v48, %v742_v17 }
 0x19f   :  { %v762_v5 = vrot.slane %v748_v38, %v754_v53 }
 0x1a1   :  { %v763_v25 = vcombine.low %v755_v60, %v762_v5 }
 0x1a3   :  { %v770_v2 = vrot.slane %v763_v25, %v754_v53 }
 0x1a5   :  { %776 = vst.msk [vmem:[#allocation7] sm:$0xf] %vm774_vm8, %v770_v2 }
 0x1a6   :  { %973 = shalt.err (!%p970_p6)
}
 0x1a7   :  { %s974_s16 = scalar_lea.hbm %s1376_s3, 64 }
 0x1a8   :  { %p975_p7 = scmp.ne.s32.totalorder %s1376_s3, %s974_s16  ;;  %p978_p8 = scmp.lt.u32.totalorder %s974_s16, %s1376_s3 }
 0x1aa   :  { %p980_p9 = pnand %p978_p8, %p975_p7 }
 0x1ac   :  { %983 = shalt.err (!%p980_p9)
}
 0x1ad   :  { %786 = dma.vmem_to_hbm [thread:$0]  %s784_s12, 64, %s1376_s3, [#allocation4]  }
 0x1ae   :  { %988 = dma.done.wait [#allocation4], 64  }
 0x1af   :  { %989 = vsyncadd [#allocation4], 4294967232 }
 0x1b0   :  { %790 = vsyncpa [#allocation3], 1 }
 0x1b1   :  { %791 = vsyncpa [#allocation6], 1 }
 0x1b2   :  { %792 = vsyncpa [#allocation4], 1 }

</bundles_post_ra>
